<compile_context>
chip_gen: v7x
topology: tpu7x:2x2x1
jax: 0.10.0
libtpu: 0.0.40
codegen_flags: <defaults>
</compile_context>

<pallas_src>
import functools

import jax
import jax.numpy as jnp
from jax.experimental import pallas as pl
from jax.experimental.pallas import tpu as pltpu


def _pack_params(spike_weight, balance_weight, target_rate, extra=()):
    vals = [spike_weight, balance_weight, target_rate, *extra]
    return jnp.stack([jnp.asarray(v, jnp.float32).reshape(()) for v in vals])


def _sublane_multiple(dtype) -> int:
    """Sublane packing factor for the dtype (f32: 8, bf16: 16, int8/bool: 32)."""
    return {4: 8, 2: 16, 1: 32}.get(jnp.dtype(dtype).itemsize, 8)


def _pick_tile_rows(rows: int, dtype, max_rows: int = 512) -> int:
    """Largest divisor of `rows` that is <= max_rows and a multiple of the
    dtype's sublane pack factor.  Falls back to a whole-layer block (block ==
    full array dims is always a legal tiling)."""
    m = _sublane_multiple(dtype)
    if rows <= max_rows or rows % m != 0:
        return rows
    tr = max_rows - (max_rows % m)
    while tr >= m:
        if rows % tr == 0:
            return tr
        tr -= m
    return rows


# -----------------------------------------------------------------------------
# Kernel 1: loss from already-reduced per-layer spike rates (exact module API).
# (Pure dispatch overhead by construction -- kept for API fidelity; the fused
#  kernel below folds the same epilogue math where the bytes actually live.)
# -----------------------------------------------------------------------------
def _rate_loss_kernel(params_ref, rates_ref, out_ref):
    """params_ref: SMEM (3,) f32 = [spike_w, balance_w, target_rate].
    rates_ref: VMEM (1, L) f32, unpadded.  out_ref: SMEM (1,) f32 loss."""
    sw = params_ref[0]
    bw = params_ref[1]
    tr = params_ref[2]
    r = rates_ref[...]
    d = r - tr
    out_ref[0] = jnp.sum(sw * r + bw * d * d)   # single fused reduction


def spiking_regularizer(spike_counts: dict,
                        spike_weight=0.001,
                        balance_weight=0.01,
                        target_rate=0.1) -> jax.Array:
    """Pallas TPU implementation of SpikingRegularizer.forward (dict of rates)."""
    rates = jnp.stack([jnp.asarray(v, dtype=jnp.float32).reshape(())
                       for v in spike_counts.values()]).reshape(1, -1)
    params = _pack_params(spike_weight, balance_weight, target_rate)

    out = pl.pallas_call(
        _rate_loss_kernel,
        out_shape=jax.ShapeDtypeStruct((1,), jnp.float32),
        in_specs=[
            pl.BlockSpec(memory_space=pltpu.SMEM),   # hyper-params (scalars)
            pl.BlockSpec(memory_space=pltpu.VMEM),   # (1, L) rates
        ],
        out_specs=pl.BlockSpec(memory_space=pltpu.SMEM),
    )(params, rates)
    return out[0]


# -----------------------------------------------------------------------------
# Kernel 2: fused variant -- per-layer mean over raw spike tensors + weighted
# combine.  Layers are streamed from HBM (pl.ANY refs) with emit_pipeline.
# -----------------------------------------------------------------------------
def _fused_spikes_kernel(params_ref, *refs, layer_rows, layer_tile_rows):
    """params_ref: SMEM (3 + L,) f32 = [sw, bw, tr, inv_n_0, ..., inv_n_{L-1}].
    refs: L layer HBM refs (each (rows_l, 128), stored dtype), then out_ref
    (SMEM (1,) f32), then acc_ref (VMEM (1,128) f32 vector accumulator)."""
    num_layers = len(layer_rows)
    layer_refs = refs[:num_layers]
    out_ref = refs[num_layers]
    acc_ref = refs[num_layers + 1]

    sw = params_ref[0]
    bw = params_ref[1]
    tr = params_ref[2]

    loss = jnp.float32(0.0)
    for l in range(num_layers):                     # unrolled at trace time
        rows = layer_rows[l]
        tile_rows = layer_tile_rows[l]

        acc_ref[...] = jnp.zeros_like(acc_ref)      # reset per-layer partials

        def tile_body(spk_vmem):
            # stored dtype -> f32 cast on the VPU; lane-parallel partial sum
            # (no per-tile scalar reduce, no per-tile SMEM read-modify-write).
            acc_ref[...] += jnp.sum(spk_vmem[...].astype(jnp.float32),
                                    axis=0, keepdims=True)

        pltpu.emit_pipeline(
            tile_body,
            grid=(rows // tile_rows,),
            in_specs=[pl.BlockSpec((tile_rows, 128), lambda t: (t, 0))],
        )(layer_refs[l])

        # One XLU lane-reduce + scalar epilogue per LAYER (nonlinear square
        # applied only after the layer's full sum is finalized).
        rate = jnp.sum(acc_ref[...]) * params_ref[3 + l]   # mean firing rate
        d = rate - tr
        loss = loss + sw * rate + bw * d * d

    out_ref[0] = loss


def spiking_regularizer_from_spikes(spike_tensors: dict,
                                    spike_weight=0.001,
                                    balance_weight=0.01,
                                    target_rate=0.1) -> jax.Array:
    """Fused: per-layer mean over raw spike tensors + weighted combine, one call."""
    layers2d, inv_ns, layer_rows, layer_tile_rows = [], [], [], []
    for v in spike_tensors.values():
        v = jnp.asarray(v)                 # keep stored dtype (bf16/uint8/...)
        n = v.size
        m = _sublane_multiple(v.dtype)
        rows = (n + 127) // 128
        flat = v.reshape(-1)               # lane-dense view; no cross-layer stack
        if rows * 128 != n:
            # Ragged tail: we must copy this layer anyway, so round rows up to
            # the sublane pack for aligned tiling (< m*128 extra zeros; zeros
            # do not change the spike sum -- we divide by the TRUE n below).
            rows = ((rows + m - 1) // m) * m
            flat = jnp.concatenate(
                [flat, jnp.zeros((rows * 128 - n,), flat.dtype)])
        layers2d.append(flat.reshape(rows, 128))
        inv_ns.append(1.0 / n)
        layer_rows.append(rows)
        layer_tile_rows.append(_pick_tile_rows(rows, v.dtype))

    num_layers = len(layers2d)
    params = _pack_params(spike_weight, balance_weight, target_rate,
                          extra=inv_ns)

    kernel = functools.partial(_fused_spikes_kernel,
                               layer_rows=tuple(layer_rows),
                               layer_tile_rows=tuple(layer_tile_rows))

    out = pl.pallas_call(
        kernel,
        out_shape=jax.ShapeDtypeStruct((1,), jnp.float32),
        in_specs=[pl.BlockSpec(memory_space=pltpu.SMEM)]          # hyper-params
                 + [pl.BlockSpec(memory_space=pl.ANY)] * num_layers,  # HBM refs
        out_specs=pl.BlockSpec(memory_space=pltpu.SMEM),
        scratch_shapes=[pltpu.VMEM((1, 128), jnp.float32)],       # vector acc
    )(params, *layers2d)
    return out[0]


if __name__ == "__main__":
    key = jax.random.PRNGKey(0)

    # Spiking-UNet-like per-layer binary spike tensors (NCHW, batch=2), stored
    # in bf16 (the fused kernel keeps the stored dtype through the DMA).
    # Sizes are ragged on purpose; "decoder2" is not a multiple of 128 to
    # exercise the tail-pad path.
    layer_shapes = {
        "encoder1":   (2, 4, 16, 16),
        "encoder2":   (2, 8, 16, 16),
        "encoder3":   (2, 16, 8, 8),
        "bottleneck": (2, 32, 8, 8),
        "decoder1":   (2, 16, 8, 8),
        "decoder2":   (2, 3, 15, 17),
    }
    spike_tensors = {}
    for name, shp in layer_shapes.items():
        key, sub = jax.random.split(key)
        spike_tensors[name] = (jax.random.uniform(sub, shp) < 0.15
                               ).astype(jnp.bfloat16)

    # Scalar per-layer spike rates = what the PyTorch module's forward receives.
    spike_counts = {k: jnp.mean(v.astype(jnp.float32))
                    for k, v in spike_tensors.items()}

    sw, bw, tr = 0.001, 0.01, 0.1

    loss_rates = spiking_regularizer(spike_counts, sw, bw, tr)
    loss_fused = spiking_regularizer_from_spikes(spike_tensors, sw, bw, tr)
    loss_rates, loss_fused = jax.block_until_ready((loss_rates, loss_fused))

    # Pure-JAX reference (same math as the PyTorch module).
    total = sum(spike_counts.values())
    imbalance = sum((v - tr) ** 2 for v in spike_counts.values())
    ref = sw * total + bw * imbalance

    assert jnp.allclose(loss_rates, ref, rtol=1e-5, atol=1e-6), (loss_rates, ref)
    assert jnp.allclose(loss_fused, ref, rtol=1e-5, atol=1e-6), (loss_fused, ref)
    print("KERNEL_OK")
</pallas_src>

<mosaic_0001>
module attributes {stable_mosaic.version = 11 : i64} {
  func.func @_rate_loss_kernel(%arg0: memref<3xf32, #tpu.memory_space<smem>>, %arg1: memref<1x6xf32, #tpu.memory_space<vmem>>, %arg2: memref<1xf32, #tpu.memory_space<smem>>) attributes {dimension_semantics = [], scalar_prefetch = 0 : i64, scratch_operands = 0 : i64, tpu.core_type = #tpu.core_type<tc>} {
    %c0 = arith.constant 0 : index
    %0 = memref.load %arg0[%c0] : memref<3xf32, #tpu.memory_space<smem>>
    %c1 = arith.constant 1 : index
    %1 = memref.load %arg0[%c1] : memref<3xf32, #tpu.memory_space<smem>>
    %c2 = arith.constant 2 : index
    %2 = memref.load %arg0[%c2] : memref<3xf32, #tpu.memory_space<smem>>
    %c0_0 = arith.constant 0 : index
    %c0_1 = arith.constant 0 : index
    %3 = vector.load %arg1[%c0_0, %c0_1] : memref<1x6xf32, #tpu.memory_space<vmem>>, vector<1x6xf32>
    %4 = vector.broadcast %2 : f32 to vector<1x6xf32>
    %5 = arith.subf %3, %4 : vector<1x6xf32>
    %6 = vector.broadcast %0 : f32 to vector<1x6xf32>
    %7 = arith.mulf %6, %3 : vector<1x6xf32>
    %8 = vector.broadcast %1 : f32 to vector<1x6xf32>
    %9 = arith.mulf %8, %5 : vector<1x6xf32>
    %10 = arith.mulf %9, %5 : vector<1x6xf32>
    %11 = arith.addf %7, %10 : vector<1x6xf32>
    %12 = vector.shape_cast %11 : vector<1x6xf32> to vector<1x1x6xf32>
    %cst = arith.constant dense<0.000000e+00> : vector<1xf32>
    %13 = vector.multi_reduction <add>, %12, %cst [1, 2] : vector<1x1x6xf32> to vector<1xf32>
    %14 = vector.shape_cast %13 : vector<1xf32> to vector<1x1x1xf32>
    %15 = vector.extract %14[0, 0, 0] : f32 from vector<1x1x1xf32>
    %c0_2 = arith.constant 0 : index
    %16 = memref.load %arg2[%c0_2] : memref<1xf32, #tpu.memory_space<smem>>
    memref.store %15, %arg2[%c0_2] : memref<1xf32, #tpu.memory_space<smem>>
    return
  }
}

</mosaic_0001>

<bundles_post_ra>
// kernel: tpu_custom_call.1
= control target key start
LH: loop header
LB: loop body
LE: loop exit
PB: predicated region body
PF: predicated region fallthrough
CT: control target
= control target key end

     0   :  { %7 = vsyncpa [#allocation3], 0  ;;  %s136_s0 = inlined_call_operand.hbm [shape: f32[3], index: 0, kind: input, shape index: {}]   ;;  %s137_s1 = inlined_call_operand.vmem [shape: f32[1,6], index: 1, kind: input, shape index: {}]   ;;  %s138_s2 = inlined_call_operand.hbm [shape: f32[1], index: 2, kind: output, shape index: {}]  }
   0x1   :  { %8 = vsyncpa [#allocation4], 0  ;;  %s68_s11 = scalar_lea.hbm %s136_s0, 16 }
   0x2   :  { %p69_p0 = scmp.ne.s32.totalorder %s136_s0, %s68_s11  ;;  %p72_p1 = scmp.lt.u32.totalorder %s68_s11, %s136_s0 }
   0x4   :  { %p74_p2 = pnand %p72_p1, %p69_p0 }
   0x6   :  { %77 = shalt.err (!%p74_p2)
}
   0x7   :  { %s92_s16 = smov [#allocation2]  }
   0x8   :  { %16 = dma.hbm_to_smem %s136_s0, 16, %s92_s16, [#allocation3]  }
   0x9   :  { %88 = dma.done.wait [#allocation3], 16  }
   0xa   :  { %89 = vsyncadd [#allocation3], 4294967280 }
   0xb   :  { %22 = sfence }
   0xc   :  { %s23_s19 = sld [smem:[#allocation2]]  ;;  %s62_s20 = sld [smem:[#allocation2 + $0x1]]  ;;  %v26_v0 = vld [vmem:[%s137_s1] sm:$0x1]  ;;  %vm35_vm0 = vcmask 40960  }
   0xd   :  { %s63_s21 = sld [smem:[#allocation2 + $0x2]]  ;;  %s78_s25 = scalar_lea.hbm %s138_s2, 16 }
   0xe   :  { %p79_p3 = scmp.ne.s32.totalorder %s138_s2, %s78_s25  ;;  %p82_p4 = scmp.lt.u32.totalorder %s78_s25, %s138_s2 }
  0x10   :  { %p84_p5 = pnand %p82_p4, %p79_p3 }
  0x12   :  { %v29_v2 = vstv %s23_s19  ;;  %v31_v3 = vstv %s62_s20 }
  0x13   :  { %v27_v1 = vstv %s63_s21  ;;  %v30_v5 = vmul.f32 %v29_v2, %v26_v0 }
  0x14   :  { %v28_v4 = vsub.f32 %v26_v0, %v27_v1 }
  0x16   :  { %v32_v6 = vmul.f32 %v31_v3, %v28_v4 }
  0x18   :  { %v33_v7 = vmul.f32 %v32_v6, %v28_v4 }
  0x1a   :  { %v34_v8 = vadd.f32 %v33_v7, %v30_v5 }
  0x1c   :  { %v36_v9 = vsel %vm35_vm0, %v34_v8, 0.0 }
  0x1d   :  { %37 = vadd.xlane.f32.xlu0 %v36_v9 }
  0xaa   :  { %v38_v10 = vpop.xlane.xlu0 %37 }
  0xab   :  { %v39_v11 = vrot.slane %v38_v10, 4 }
  0xad   :  { %v40_v12 = vadd.f32 %v39_v11, %v38_v10 }
  0xaf   :  { %v41_v13 = vrot.slane %v40_v12, 2 }
  0xb1   :  { %v42_v14 = vadd.f32 %v41_v13, %v40_v12 }
  0xb3   :  { %v43_v15 = vrot.slane %v42_v14, 1 }
  0xb5   :  { %v44_v16 = vadd.f32 %v43_v15, %v42_v14 }
  0xb7   :  { %64 = vpush %v44_v16 }
  0xe8   :  { %s65_s0 = spop %64 }
  0xe9   :  { %47 = sst [smem:[#allocation5]] %s65_s0 }
  0xea   :  { %87 = shalt.err (!%p84_p5)
}
  0xeb   :  { %s93_s30 = smov [#allocation5]  }
  0xec   :  { %55 = dma.smem_to_hbm %s93_s30, 16, %s138_s2, [#allocation4]  }
  0xed   :  { %90 = dma.done.wait [#allocation4], 16  }
  0xee   :  { %91 = vsyncadd [#allocation4], 4294967280 }
  0xef   :  { %59 = sfence }
  0xf0   :  { %60 = vsyncpa [#allocation3], 1 }
  0xf1   :  { %61 = vsyncpa [#allocation4], 1 }

</bundles_post_ra>
